<compile_context>
chip_gen: v7x
topology: tpu7x:2x2x1
jax: 0.10.0
libtpu: 0.0.40
codegen_flags: <defaults>
</compile_context>

<pallas_src>
from functools import partial

import jax
import jax.numpy as jnp
from jax.experimental import pallas as pl
from jax.experimental.pallas import tpu as pltpu


def _add3_kernel(x204_ref, x190_ref, x219_ref, o_ref):
    # Fused: x220 = x219 + (x204 + x190), pure VPU elementwise work.
    o_ref[...] = x219_ref[...] + (x204_ref[...] + x190_ref[...])


def _lane_dense_2d(n):
    """Pick a (sublane, lane) factorization of n that maximizes vreg packing."""
    for s in (8, 4, 2, 1):
        if n % s == 0:
            return (s, n // s)
    return (1, n)


@partial(jax.jit, donate_argnums=(2,))
def add3(x204, x190, x219):
    assert x204.shape == x190.shape == x219.shape
    assert x204.dtype == x190.dtype == x219.dtype

    orig_shape = x204.shape
    n_elems = x204.size
    shape2d = _lane_dense_2d(n_elems)  # (8, 1176) for (1, 192, 7, 7) f32
    itemsize = jnp.dtype(x204.dtype).itemsize

    # Whole array resident in VMEM; no grid, no pipelining (tensor is tiny).
    vmem_spec = pl.BlockSpec(memory_space=pltpu.MemorySpace.VMEM)

    # Under jit these reshapes are free bitcasts (row-major, same size).
    a = x204.reshape(shape2d)
    b = x190.reshape(shape2d)
    c = x219.reshape(shape2d)

    out2d = pl.pallas_call(
        _add3_kernel,
        out_shape=jax.ShapeDtypeStruct(shape2d, x204.dtype),
        in_specs=[vmem_spec, vmem_spec, vmem_spec],
        out_specs=vmem_spec,
        # Reuse x219's (donated) buffer for the result (in-place update).
        input_output_aliases={2: 0},
        # Advisory hint: 2 adds per element, 3 reads + 1 write per element.
        cost_estimate=pl.CostEstimate(
            flops=2 * n_elems,
            transcendentals=0,
            bytes_accessed=4 * itemsize * n_elems,
        ),
    )(a, b, c)

    return out2d.reshape(orig_shape)


if __name__ == "__main__":
    key = jax.random.PRNGKey(0)
    k1, k2, k3 = jax.random.split(key, 3)
    # Shapes match the module's forward: (1, 192, 7, 7) float32 (NCHW)
    shape = (1, 192, 7, 7)
    x190 = jax.random.normal(k1, shape, dtype=jnp.float32)
    x204 = jax.random.normal(k2, shape, dtype=jnp.float32)
    x219 = jax.random.normal(k3, shape, dtype=jnp.float32)

    # Compute reference BEFORE the kernel: x219 is donated and must not be
    # reused by the caller afterwards.
    ref = x219 + (x204 + x190)
    jax.block_until_ready(ref)

    out = add3(x204, x190, x219)
    jax.block_until_ready(out)

    assert out.shape == shape
    assert jnp.allclose(out, ref, atol=1e-6), "mismatch vs reference"
    print("KERNEL_OK")
</pallas_src>

<mosaic_0001>
module attributes {stable_mosaic.version = 11 : i64} {
  func.func @_add3_kernel(%arg0: memref<8x1176xf32, #tpu.memory_space<vmem>>, %arg1: memref<8x1176xf32, #tpu.memory_space<vmem>>, %arg2: memref<8x1176xf32, #tpu.memory_space<vmem>>, %arg3: memref<8x1176xf32, #tpu.memory_space<vmem>>) attributes {dimension_semantics = [], scalar_prefetch = 0 : i64, scratch_operands = 0 : i64, tpu.core_type = #tpu.core_type<tc>} {
    %c0 = arith.constant 0 : index
    %c0_0 = arith.constant 0 : index
    %0 = vector.load %arg2[%c0, %c0_0] : memref<8x1176xf32, #tpu.memory_space<vmem>>, vector<8x1176xf32>
    %c0_1 = arith.constant 0 : index
    %c0_2 = arith.constant 0 : index
    %1 = vector.load %arg0[%c0_1, %c0_2] : memref<8x1176xf32, #tpu.memory_space<vmem>>, vector<8x1176xf32>
    %c0_3 = arith.constant 0 : index
    %c0_4 = arith.constant 0 : index
    %2 = vector.load %arg1[%c0_3, %c0_4] : memref<8x1176xf32, #tpu.memory_space<vmem>>, vector<8x1176xf32>
    %3 = arith.addf %1, %2 : vector<8x1176xf32>
    %4 = arith.addf %0, %3 : vector<8x1176xf32>
    %c0_5 = arith.constant 0 : index
    %c0_6 = arith.constant 0 : index
    %5 = vector.load %arg3[%c0_5, %c0_6] : memref<8x1176xf32, #tpu.memory_space<vmem>>, vector<8x1176xf32>
    tpu.vector_store %arg3[%c0_5, %c0_6], %4 {strides = array<i32>} : memref<8x1176xf32, #tpu.memory_space<vmem>>, vector<8x1176xf32>,
    return
  }
}

</mosaic_0001>

<bundles_post_ra>
// kernel: add3.1
= control target key start
LH: loop header
LB: loop body
LE: loop exit
PB: predicated region body
PF: predicated region fallthrough
CT: control target
= control target key end

     0   :  { %vm73_vm0 = vcmask 195584   ;;  %s219_s0 = inlined_call_operand.vmem [shape: f32[8,1176], index: 0, kind: input, shape index: {}]   ;;  %s220_s1 = inlined_call_operand.vmem [shape: f32[8,1176], index: 1, kind: input, shape index: {}]   ;;  %s221_s2 = inlined_call_operand.vmem [shape: f32[8,1176], index: 2, kind: input, shape index: {}, may-alias: {2,3}]   ;;  %s222_s3 = inlined_call_operand.vmem [shape: f32[8,1176], index: 3, kind: output, shape index: {}, may-alias: {2,3}]  }
   0x1   :  { %v14_v0 = vld [vmem:[%s221_s2] sm:$0xff]  ;;  %v15_v4 = vld [vmem:[%s221_s2 + $0x8] sm:$0xff]  ;;  %v16_v8 = vld [vmem:[%s221_s2 + $0x10] sm:$0xff] }
   0x2   :  { %v24_v1 = vld [vmem:[%s219_s0] sm:$0xff]  ;;  %v25_v5 = vld [vmem:[%s219_s0 + $0x8] sm:$0xff]  ;;  %v26_v9 = vld [vmem:[%s219_s0 + $0x10] sm:$0xff] }
   0x3   :  { %v34_v2 = vld [vmem:[%s220_s1] sm:$0xff]  ;;  %v35_v6 = vld [vmem:[%s220_s1 + $0x8] sm:$0xff]  ;;  %v36_v10 = vld [vmem:[%s220_s1 + $0x10] sm:$0xff] }
   0x4   :  { %v44_v3 = vadd.f32 %v34_v2, %v24_v1  ;;  %v45_v7 = vadd.f32 %v35_v6, %v25_v5  ;;  %v46_v12 = vadd.f32 %v36_v10, %v26_v9  ;;  %v17_v13 = vld [vmem:[%s221_s2 + $0x18] sm:$0xff]  ;;  %v18_v18 = vld [vmem:[%s221_s2 + $0x20] sm:$0xff]  ;;  %v29_v24 = vld [vmem:[%s219_s0 + $0x28] sm:$0xff] }
   0x5   :  { %v27_v14 = vld [vmem:[%s219_s0 + $0x18] sm:$0xff]  ;;  %v28_v19 = vld [vmem:[%s219_s0 + $0x20] sm:$0xff]  ;;  %v39_v25 = vld [vmem:[%s220_s1 + $0x28] sm:$0xff] }
   0x6   :  { %v54_v11 = vadd.f32 %v44_v3, %v14_v0  ;;  %v37_v15 = vld [vmem:[%s220_s1 + $0x18] sm:$0xff]  ;;  %v55_v16 = vadd.f32 %v45_v7, %v15_v4  ;;  %v38_v20 = vld [vmem:[%s220_s1 + $0x20] sm:$0xff]  ;;  %v56_v21 = vadd.f32 %v46_v12, %v16_v8  ;;  %v49_v27 = vadd.f32 %v39_v25, %v29_v24  ;;  %v30_v29 = vld [vmem:[%s219_s0 + $0x30] sm:$0xff] }
   0x7   :  { %v47_v17 = vadd.f32 %v37_v15, %v27_v14  ;;  %v48_v22 = vadd.f32 %v38_v20, %v28_v19  ;;  %v40_v30 = vld [vmem:[%s220_s1 + $0x30] sm:$0xff]  ;;  %v31_v34 = vld [vmem:[%s219_s0 + $0x38] sm:$0xff]  ;;  %v32_v39 = vld [vmem:[%s219_s0 + $0x40] sm:$0xff] }
   0x8   :  { %64 = vst [vmem:[%s222_s3] sm:$0xff] %v54_v11  ;;  %v50_v32 = vadd.f32 %v40_v30, %v30_v29  ;;  %v41_v35 = vld [vmem:[%s220_s1 + $0x38] sm:$0xff]  ;;  %v42_v40 = vld [vmem:[%s220_s1 + $0x40] sm:$0xff]  ;;  %v33_v44 = vld [vmem:[%s219_s0 + $0x48] sm:$0xff] }
   0x9   :  { %v57_v26 = vadd.f32 %v47_v17, %v17_v13  ;;  %v58_v31 = vadd.f32 %v48_v22, %v18_v18  ;;  %v51_v37 = vadd.f32 %v41_v35, %v31_v34  ;;  %v52_v42 = vadd.f32 %v42_v40, %v32_v39  ;;  %v43_v45 = vld [vmem:[%s220_s1 + $0x48] sm:$0xff] }
   0xa   :  { %v53_v47 = vadd.f32 %v43_v45, %v33_v44 }
   0xf   :  { %v19_v23 = vld [vmem:[%s221_s2 + $0x28] sm:$0xff] }
  0x10   :  { %65 = vst [vmem:[%s222_s3 + $0x8] sm:$0xff] %v55_v16  ;;  %v59_v36 = vadd.f32 %v49_v27, %v19_v23 }
  0x17   :  { %v20_v28 = vld [vmem:[%s221_s2 + $0x30] sm:$0xff] }
  0x18   :  { %66 = vst [vmem:[%s222_s3 + $0x10] sm:$0xff] %v56_v21  ;;  %v60_v41 = vadd.f32 %v50_v32, %v20_v28 }
  0x1f   :  { %v21_v33 = vld [vmem:[%s221_s2 + $0x38] sm:$0xff] }
  0x20   :  { %67 = vst [vmem:[%s222_s3 + $0x18] sm:$0xff] %v57_v26  ;;  %v61_v46 = vadd.f32 %v51_v37, %v21_v33 }
  0x27   :  { %v22_v38 = vld [vmem:[%s221_s2 + $0x40] sm:$0xff] }
  0x28   :  { %68 = vst [vmem:[%s222_s3 + $0x20] sm:$0xff] %v58_v31  ;;  %v62_v48 = vadd.f32 %v52_v42, %v22_v38 }
  0x2f   :  { %v23_v43 = vld [vmem:[%s221_s2 + $0x48] sm:$0xff] }
  0x30   :  { %69 = vst [vmem:[%s222_s3 + $0x28] sm:$0xff] %v59_v36  ;;  %70 = vst [vmem:[%s222_s3 + $0x30] sm:$0xff] %v60_v41  ;;  %v63_v49 = vadd.f32 %v53_v47, %v23_v43 }
  0x31   :  { %71 = vst [vmem:[%s222_s3 + $0x38] sm:$0xff] %v61_v46  ;;  %72 = vst [vmem:[%s222_s3 + $0x40] sm:$0xff] %v62_v48 }
  0x32   :  { %74 = vst.msk [vmem:[%s222_s3 + $0x48] sm:$0xff] %vm73_vm0, %v63_v49 }

</bundles_post_ra>
